<compile_context>
chip_gen: v7x
topology: tpu7x:2x2x1
jax: 0.10.0
libtpu: 0.0.40
codegen_flags: <defaults>
</compile_context>

<pallas_src>
import functools

import jax
import jax.numpy as jnp
from jax.experimental import pallas as pl
from jax.experimental.pallas import tpu as pltpu


_INV_SQRT2 = 0.7071067811865476


def _round_up(x, m):
    return ((x + m - 1) // m) * m


def _gelu_exact(h):
    # Exact GELU (matches torch nn.GELU default, approximate='none').
    return 0.5 * h * (1.0 + jax.lax.erf(h * _INV_SQRT2))


# ----------------------------- kernels --------------------------------------


def _mlp_kernel_resident(x_ref, w1_ref, b1_ref, w2_ref, b2_ref, o_ref):
    # Weights fully VMEM-resident: constant block indices across the grid, so
    # Pallas fetches W1/W2/b1/b2 from HBM once and reuses them for every row
    # tile. Single grid axis (rows, "parallel").
    x = x_ref[...].astype(w1_ref.dtype)      # in-kernel cast hides under the MXU
    h = jnp.dot(x, w1_ref[...], preferred_element_type=jnp.float32) + b1_ref[...]
    h = _gelu_exact(h)
    # Dropout with p=0.0 is the identity -> no-op.
    out = jnp.dot(h.astype(w2_ref.dtype), w2_ref[...],
                  preferred_element_type=jnp.float32) + b2_ref[...]
    o_ref[...] = out.astype(o_ref.dtype)


def _mlp_kernel_chunked(x_ref, w1_ref, b1_ref, w2_ref, b2_ref, o_ref, acc_ref):
    # Hidden dim split over grid axis 1 (reduction, "arbitrary") with an f32
    # VMEM accumulator; used only when the weights don't fit the VMEM budget.
    k = pl.program_id(1)

    @pl.when(k == 0)
    def _():
        # Fold the fc2 bias into the accumulator init (saves an epilogue add).
        acc_ref[...] = jnp.broadcast_to(b2_ref[...], acc_ref.shape)

    x = x_ref[...].astype(w1_ref.dtype)
    h = jnp.dot(x, w1_ref[...], preferred_element_type=jnp.float32) + b1_ref[...]
    h = _gelu_exact(h)
    acc_ref[...] += jnp.dot(h.astype(w2_ref.dtype), w2_ref[...],
                            preferred_element_type=jnp.float32)

    @pl.when(k == pl.num_programs(1) - 1)
    def _():
        o_ref[...] = acc_ref[...].astype(o_ref.dtype)


# --------------------------- planning helpers --------------------------------


def _vmem_budget_bytes():
    """Generation-aware VMEM budget: capacity minus headroom for Mosaic scratch."""
    cap = 64 * 2 ** 20
    try:
        cap = int(pltpu.get_tpu_info().vmem_capacity_bytes)
    except Exception:
        pass
    return max(32 * 2 ** 20, cap - 8 * 2 ** 20)


def _vmem_need(tm, tk, in_f, out_fp, x_isz, out_isz, resident):
    """Conservative VMEM estimate (double-buffered operands + temporaries)."""
    need = (2 * tm * in_f * x_isz          # x tile
            + 2 * in_f * tk * 2            # W1 (bf16)
            + 2 * tk * 4                   # b1
            + 2 * tk * out_fp * 2          # W2 (bf16)
            + 2 * out_fp * 4               # b2
            + 2 * tm * out_fp * out_isz    # out tile
            + tm * tk * 6)                 # h temporaries (f32 + bf16 copy)
    if not resident:
        need += tm * out_fp * 4            # f32 accumulator scratch
    return int(need)


# ------------------------------ wrapper --------------------------------------


def make_mlp_pallas(w1, b1, w2, b2, *, tile_m=512, compute_dtype=jnp.bfloat16):
    """Pre-pad / pre-cast the parameters once; return a jitted apply(x).

    w1: [in_f, hid], b1: [hid], w2: [hid, out_f], b2: [out_f]
    (weights stored [in, out], i.e. transposed vs torch nn.Linear's [out, in]).
    """
    in_f, hid = w1.shape
    out_f = w2.shape[1]
    budget = _vmem_budget_bytes()

    # Pad hidden / output dims to multiples of 256: fills the 256x256 MXU on
    # v6e/v7x; 256 is a multiple of 128 so stores stay lane-dense on v5e too.
    out_fp = _round_up(out_f, 256)
    hid_pad = _round_up(hid, 256)

    # Prefer the fully weight-resident plan (tk == hid_pad, single k step);
    # chunk the hidden dim only when the weights don't fit the VMEM budget.
    tk = hid_pad
    while (_vmem_need(tile_m, tk, in_f, out_fp, 4, 4, tk == hid_pad) > budget
           and tk > 256):
        tk = 256 * max(1, (tk // 256) // 2)
    hid_pad = _round_up(hid, tk)           # keep tk an exact divisor
    resident = (tk == hid_pad)

    # One-time parameter prep (outside the per-call hot path): cast to the MXU
    # compute dtype and zero-pad. Zero W1 columns / b1 entries give GELU(0)=0
    # and the matching W2 rows are zero, so padding is numerically inert.
    w1p = jnp.zeros((in_f, hid_pad), compute_dtype).at[:, :hid].set(
        w1.astype(compute_dtype))
    b1p = jnp.zeros((1, hid_pad), jnp.float32).at[:, :hid].set(
        b1.reshape(1, hid).astype(jnp.float32))
    w2p = jnp.zeros((hid_pad, out_fp), compute_dtype).at[:hid, :out_f].set(
        w2.astype(compute_dtype))
    b2p = jnp.zeros((1, out_fp), jnp.float32).at[:, :out_f].set(
        b2.reshape(1, out_f).astype(jnp.float32))

    def apply(x, w1p, b1p, w2p, b2p):
        B, N, _ = x.shape
        M = B * N
        out_dtype = x.dtype
        x_isz = jnp.dtype(x.dtype).itemsize
        out_isz = jnp.dtype(out_dtype).itemsize

        # Row tiling: 16-row minimum (dense bf16 sublane packing); >= 2 row
        # tiles when there is enough work so both v7x TensorCores get a share
        # of the "parallel" axis; balance tiles so the last one isn't mostly
        # padding.
        tm = min(tile_m, _round_up(M, 16))
        n_row_tiles = -(-M // tm)
        if n_row_tiles == 1 and tm >= 512:
            n_row_tiles = 2
        tm = _round_up(-(-M // n_row_tiles), 16)
        m_pad = tm * n_row_tiles

        x2d = x.reshape(M, in_f)
        if m_pad != M:
            x2d = jnp.pad(x2d, ((0, m_pad - M), (0, 0)))

        need = _vmem_need(tm, tk, in_f, out_fp, x_isz, out_isz, resident)
        vmem_limit = int(min(budget, max(32 * 2 ** 20, int(need * 1.3))))

        w_bytes = (w1p.size + w2p.size) * 2 + (b1p.size + b2p.size) * 4
        cost = pl.CostEstimate(
            flops=2 * M * (in_f * hid_pad + hid_pad * out_fp),
            transcendentals=M * hid_pad,
            bytes_accessed=int(x2d.size * x_isz
                               + w_bytes * (1 if resident else n_row_tiles)
                               + m_pad * out_fp * out_isz),
        )

        if resident:
            grid = (n_row_tiles,)
            in_specs = [
                pl.BlockSpec((tm, in_f), lambda i: (i, 0)),         # x rows
                pl.BlockSpec((in_f, hid_pad), lambda i: (0, 0)),    # W1 (resident)
                pl.BlockSpec((1, hid_pad), lambda i: (0, 0)),       # b1
                pl.BlockSpec((hid_pad, out_fp), lambda i: (0, 0)),  # W2 (resident)
                pl.BlockSpec((1, out_fp), lambda i: (0, 0)),        # b2
            ]
            out_specs = pl.BlockSpec((tm, out_fp), lambda i: (i, 0))
            scratch_shapes = []
            kernel = _mlp_kernel_resident
            dim_sem = ("parallel",)
        else:
            # TODO(synk): if profiling shows exposed weight DMA on the k axis,
            # add pipeline_mode=pl.Buffered(3) to the W1/W2 specs only.
            grid = (n_row_tiles, hid_pad // tk)
            in_specs = [
                pl.BlockSpec((tm, in_f), lambda i, k: (i, 0)),      # x rows
                pl.BlockSpec((in_f, tk), lambda i, k: (0, k)),      # W1 chunk
                pl.BlockSpec((1, tk), lambda i, k: (0, k)),         # b1 chunk
                pl.BlockSpec((tk, out_fp), lambda i, k: (k, 0)),    # W2 chunk
                pl.BlockSpec((1, out_fp), lambda i, k: (0, 0)),     # b2
            ]
            out_specs = pl.BlockSpec((tm, out_fp), lambda i, k: (i, 0))
            scratch_shapes = [pltpu.VMEM((tm, out_fp), jnp.float32)]
            kernel = _mlp_kernel_chunked
            dim_sem = ("parallel", "arbitrary")

        out2d = pl.pallas_call(
            kernel,
            out_shape=jax.ShapeDtypeStruct((m_pad, out_fp), out_dtype),
            grid_spec=pltpu.PrefetchScalarGridSpec(
                num_scalar_prefetch=0,
                grid=grid,
                in_specs=in_specs,
                out_specs=out_specs,
                scratch_shapes=scratch_shapes,
            ),
            compiler_params=pltpu.CompilerParams(
                dimension_semantics=dim_sem,
                vmem_limit_bytes=vmem_limit,
            ),
            cost_estimate=cost,
        )(x2d, w1p, b1p, w2p, b2p)

        # Skip the slice (an extra HBM read+write of the output) when shapes
        # are already aligned (the common transformer case).
        if m_pad == M and out_fp == out_f:
            return out2d.reshape(B, N, out_f)
        return out2d[:M, :out_f].reshape(B, N, out_f)

    apply = jax.jit(apply)
    return functools.partial(apply, w1p=w1p, b1p=b1p, w2p=w2p, b2p=b2p)


def init_mlp_params(key, in_features, hidden_features, out_features,
                    dtype=jnp.float32):
    """Deterministic init mimicking nn.Linear's uniform(-1/sqrt(fan_in), ...)."""
    k1, k2, k3, k4 = jax.random.split(key, 4)
    lim1 = 1.0 / jnp.sqrt(in_features)
    lim2 = 1.0 / jnp.sqrt(hidden_features)
    w1 = jax.random.uniform(k1, (in_features, hidden_features), dtype, -lim1, lim1)
    b1 = jax.random.uniform(k2, (hidden_features,), dtype, -lim1, lim1)
    w2 = jax.random.uniform(k3, (hidden_features, out_features), dtype, -lim2, lim2)
    b2 = jax.random.uniform(k4, (out_features,), dtype, -lim2, lim2)
    return w1, b1, w2, b2


if __name__ == "__main__":
    key = jax.random.PRNGKey(0)
    B, N = 2, 8            # batch, sequence length
    in_features = 32
    hidden_features = 64
    out_features = 32      # out_features defaults to in_features in the module

    kx, kp = jax.random.split(key)
    x = jax.random.normal(kx, (B, N, in_features), jnp.float32)
    w1, b1, w2, b2 = init_mlp_params(kp, in_features, hidden_features, out_features)

    mlp = make_mlp_pallas(w1, b1, w2, b2)
    out = mlp(x)
    jax.block_until_ready(out)

    # Pure-JAX f32 reference: fc1 -> exact GELU -> fc2 (dropout p=0 identity).
    h_ref = jnp.einsum("bnc,ch->bnh", x, w1) + b1
    h_ref = 0.5 * h_ref * (1.0 + jax.lax.erf(h_ref / jnp.sqrt(2.0)))
    ref = jnp.einsum("bnh,ho->bno", h_ref, w2) + b2
    assert out.shape == (B, N, out_features)
    # bf16 MXU operands with f32 accumulation -> looser tolerance vs f32 ref.
    assert jnp.allclose(out, ref, atol=5e-2, rtol=5e-2), "mismatch vs reference"

    print("KERNEL_OK")
</pallas_src>

<mosaic_0001>
module attributes {stable_mosaic.version = 11 : i64} {
  func.func @_mlp_kernel_resident(%arg0: i32, %arg1: memref<16x32xf32, #tpu.memory_space<vmem>>, %arg2: memref<32x256xbf16, #tpu.memory_space<vmem>>, %arg3: memref<1x256xf32, #tpu.memory_space<vmem>>, %arg4: memref<256x256xbf16, #tpu.memory_space<vmem>>, %arg5: memref<1x256xf32, #tpu.memory_space<vmem>>, %arg6: memref<16x256xf32, #tpu.memory_space<vmem>>) attributes {dimension_semantics = [#tpu.dimension_semantics<parallel>], iteration_bounds = array<i64: 1>, scalar_prefetch = 0 : i64, scratch_operands = 0 : i64, tpu.core_type = #tpu.core_type<tc>, window_params = [{transform_indices = @transform_0, window_bounds = array<i64: 16, 32>}, {pipeline_mode = #tpu.pipeline_mode<synchronous>, transform_indices = @transform_1, window_bounds = array<i64: 32, 256>}, {pipeline_mode = #tpu.pipeline_mode<synchronous>, transform_indices = @transform_2, window_bounds = array<i64: 1, 256>}, {pipeline_mode = #tpu.pipeline_mode<synchronous>, transform_indices = @transform_3, window_bounds = array<i64: 256, 256>}, {pipeline_mode = #tpu.pipeline_mode<synchronous>, transform_indices = @transform_4, window_bounds = array<i64: 1, 256>}, {transform_indices = @transform_5, window_bounds = array<i64: 16, 256>}]} {
    %c0 = arith.constant 0 : index
    %c0_0 = arith.constant 0 : index
    %0 = vector.load %arg1[%c0, %c0_0] : memref<16x32xf32, #tpu.memory_space<vmem>>, vector<16x32xf32>
    %1 = arith.truncf %0 : vector<16x32xf32> to vector<16x32xbf16>
    %c0_1 = arith.constant 0 : index
    %c0_2 = arith.constant 0 : index
    %2 = vector.load %arg2[%c0_1, %c0_2] : memref<32x256xbf16, #tpu.memory_space<vmem>>, vector<32x256xbf16>
    %cst = arith.constant dense<0.000000e+00> : vector<16x256xf32>
    %3 = tpu.matmul %1, %2, %cst {dimension_numbers = #tpu.dot_dimension_numbers<[1], [0], [0], [1], [0, 0, 1, 1], [], []>} : vector<16x32xbf16>, vector<32x256xbf16>, vector<16x256xf32> -> vector<16x256xf32>
    %c0_3 = arith.constant 0 : index
    %c0_4 = arith.constant 0 : index
    %4 = vector.load %arg3[%c0_3, %c0_4] : memref<1x256xf32, #tpu.memory_space<vmem>>, vector<1x256xf32>
    %5 = vector.broadcast %4 : vector<1x256xf32> to vector<16x256xf32>
    %6 = arith.addf %3, %5 : vector<16x256xf32>
    %cst_5 = arith.constant 5.000000e-01 : f32
    %7 = vector.broadcast %cst_5 : f32 to vector<16x256xf32>
    %8 = arith.mulf %7, %6 : vector<16x256xf32>
    %cst_6 = arith.constant 0.707106769 : f32
    %9 = vector.broadcast %cst_6 : f32 to vector<16x256xf32>
    %10 = arith.mulf %6, %9 : vector<16x256xf32>
    %11 = math.erf %10 : vector<16x256xf32>
    %cst_7 = arith.constant 1.000000e+00 : f32
    %12 = vector.broadcast %cst_7 : f32 to vector<16x256xf32>
    %13 = arith.addf %12, %11 : vector<16x256xf32>
    %14 = arith.mulf %8, %13 : vector<16x256xf32>
    %15 = arith.truncf %14 : vector<16x256xf32> to vector<16x256xbf16>
    %c0_8 = arith.constant 0 : index
    %c0_9 = arith.constant 0 : index
    %16 = vector.load %arg4[%c0_8, %c0_9] : memref<256x256xbf16, #tpu.memory_space<vmem>>, vector<256x256xbf16>
    %cst_10 = arith.constant dense<0.000000e+00> : vector<16x256xf32>
    %17 = tpu.matmul %15, %16, %cst_10 {dimension_numbers = #tpu.dot_dimension_numbers<[1], [0], [0], [1], [0, 0, 1, 1], [], []>} : vector<16x256xbf16>, vector<256x256xbf16>, vector<16x256xf32> -> vector<16x256xf32>
    %c0_11 = arith.constant 0 : index
    %c0_12 = arith.constant 0 : index
    %18 = vector.load %arg5[%c0_11, %c0_12] : memref<1x256xf32, #tpu.memory_space<vmem>>, vector<1x256xf32>
    %19 = vector.broadcast %18 : vector<1x256xf32> to vector<16x256xf32>
    %20 = arith.addf %17, %19 : vector<16x256xf32>
    %c0_13 = arith.constant 0 : index
    %c0_14 = arith.constant 0 : index
    %21 = vector.load %arg6[%c0_13, %c0_14] : memref<16x256xf32, #tpu.memory_space<vmem>>, vector<16x256xf32>
    tpu.vector_store %arg6[%c0_13, %c0_14], %20 {strides = array<i32>} : memref<16x256xf32, #tpu.memory_space<vmem>>, vector<16x256xf32>,
    return
  }
  func.func @transform_0(%arg0: i32) -> (i32, i32) {
    %c0_i32 = arith.constant 0 : i32
    %c0_i32_0 = arith.constant 0 : i32
    return %arg0, %c0_i32 : i32, i32
  }
  func.func @transform_1(%arg0: i32) -> (i32, i32) {
    %c0_i32 = arith.constant 0 : i32
    %c0_i32_0 = arith.constant 0 : i32
    %c0_i32_1 = arith.constant 0 : i32
    return %c0_i32, %c0_i32_0 : i32, i32
  }
  func.func @transform_2(%arg0: i32) -> (i32, i32) {
    %c0_i32 = arith.constant 0 : i32
    %c0_i32_0 = arith.constant 0 : i32
    %c0_i32_1 = arith.constant 0 : i32
    return %c0_i32, %c0_i32_0 : i32, i32
  }
  func.func @transform_3(%arg0: i32) -> (i32, i32) {
    %c0_i32 = arith.constant 0 : i32
    %c0_i32_0 = arith.constant 0 : i32
    %c0_i32_1 = arith.constant 0 : i32
    return %c0_i32, %c0_i32_0 : i32, i32
  }
  func.func @transform_4(%arg0: i32) -> (i32, i32) {
    %c0_i32 = arith.constant 0 : i32
    %c0_i32_0 = arith.constant 0 : i32
    %c0_i32_1 = arith.constant 0 : i32
    return %c0_i32, %c0_i32_0 : i32, i32
  }
  func.func @transform_5(%arg0: i32) -> (i32, i32) {
    %c0_i32 = arith.constant 0 : i32
    %c0_i32_0 = arith.constant 0 : i32
    return %arg0, %c0_i32 : i32, i32
  }
}

</mosaic_0001>

<bundles_post_ra>
// kernel: apply.1
= control target key start
LH: loop header
LB: loop body
LE: loop exit
PB: predicated region body
PF: predicated region fallthrough
CT: control target
= control target key end

     0   :  { %10 = vsyncpa [#allocation3], 0  ;;  %s708_s0 = inlined_call_operand.hbm [shape: f32[16,32], index: 0, kind: input, shape index: {}]   ;;  %s709_s1 = inlined_call_operand.hbm [shape: bf16[32,256], index: 1, kind: input, shape index: {}]   ;;  %s710_s2 = inlined_call_operand.vmem [shape: f32[1,256], index: 2, kind: input, shape index: {}]   ;;  %s711_s3 = inlined_call_operand.hbm [shape: bf16[256,256], index: 3, kind: input, shape index: {}]   ;;  %s712_s4 = inlined_call_operand.vmem [shape: f32[1,256], index: 4, kind: input, shape index: {}]   ;;  %s713_s5 = inlined_call_operand.vmem [shape: f32[16,256], index: 5, kind: output, shape index: {}]  }
   0x1   :  { %11 = vsyncpa [#allocation5], 0  ;;  %s602_s18 = smov [#allocation4]   ;;  %s603_s20 = smov [#allocation2]  }
   0x2   :  { %s29_s19 = sshll.u32 %s602_s18, 4  ;;  %s17_s21 = sshll.u32 %s603_s20, 4  ;;  %s30_s19 = int_to_ptr.vmem [resolvable:$true] %s29_s19  ;;  %s638_s21 = int_to_ptr.vmem [resolvable:$true] %s17_s21 }
   0x3   :  { %s532_s24 = scalar_lea.hbm %s709_s1, 512 }
   0x4   :  { %p533_p0 = scmp.ne.s32.totalorder %s709_s1, %s532_s24  ;;  %p536_p1 = scmp.lt.u32.totalorder %s532_s24, %s709_s1 }
   0x6   :  { %p538_p2 = pnand %p536_p1, %p533_p0 }
   0x8   :  { %541 = shalt.err (!%p538_p2)
}
   0x9   :  { %s542_s29 = scalar_lea.vmem %s30_s19, 512  ;;  %p547_p4 = scmp.lt.s32.totalorder %s30_s19, %s30_s19 }
   0xa   :  { %p543_p3 = scmp.ne.s32.totalorder %s30_s19, %s542_s29  ;;  %p548_p5 = scmp.lt.s32.totalorder %s542_s29, %s542_s29 }
   0xc   :  { %p549_p6 = por %p548_p5, %p547_p4 }
   0xe   :  { %p550_p7 = pnand %p549_p6, %p543_p3 }
  0x10   :  { %553 = shalt.err (!%p550_p7)
}
  0x11   :  { %s604_s30 = smov 128   ;;  %s605_s6 = smov 8  }
  0x12   :  { %35 = dma.hbm_to_vmem [thread:$0]  %s709_s1, 512, %s30_s19, [#allocation5], %s604_s30, %s604_s30, %s605_s6  }
  0x13   :  { %s554_s11 = scalar_lea.hbm %s708_s0, 256 }
  0x14   :  { %p555_p8 = scmp.ne.s32.totalorder %s708_s0, %s554_s11  ;;  %p558_p9 = scmp.lt.u32.totalorder %s554_s11, %s708_s0 }
  0x16   :  { %p560_p10 = pnand %p558_p9, %p555_p8 }
  0x18   :  { %563 = shalt.err (!%p560_p10)
}
  0x19   :  { %s564_s16 = scalar_lea.vmem %s638_s21, 256  ;;  %p569_p12 = scmp.lt.s32.totalorder %s638_s21, %s638_s21 }
  0x1a   :  { %p565_p11 = scmp.ne.s32.totalorder %s638_s21, %s564_s16  ;;  %p570_p13 = scmp.lt.s32.totalorder %s564_s16, %s564_s16 }
  0x1c   :  { %p571_p0 = por %p570_p13, %p569_p12 }
  0x1e   :  { %p572_p1 = pnand %p571_p0, %p565_p11 }
  0x20   :  { %575 = shalt.err (!%p572_p1)
}
  0x21   :  { %23 = dma.hbm_to_vmem [thread:$0]  %s708_s0, 256, %s638_s21, [#allocation3], %s604_s30, %s604_s30, %s605_s6  }
  0x22   :  { %s606_s18 = smov [#allocation6]   ;;  %s576_s23 = scalar_lea.hbm %s711_s3, 4096 }
  0x23   :  { %s43_s19 = sshll.u32 %s606_s18, 4  ;;  %p577_p2 = scmp.ne.s32.totalorder %s711_s3, %s576_s23  ;;  %s44_s19 = int_to_ptr.vmem [resolvable:$true] %s43_s19 }
  0x24   :  { %p580_p3 = scmp.lt.u32.totalorder %s576_s23, %s711_s3 }
  0x26   :  { %p582_p4 = pnand %p580_p3, %p577_p2 }
  0x28   :  { %585 = shalt.err (!%p582_p4)
}
  0x29   :  { %s586_s28 = scalar_lea.vmem %s44_s19, 4096  ;;  %p591_p6 = scmp.lt.s32.totalorder %s44_s19, %s44_s19 }
  0x2a   :  { %p587_p5 = scmp.ne.s32.totalorder %s44_s19, %s586_s28  ;;  %p592_p7 = scmp.lt.s32.totalorder %s586_s28, %s586_s28 }
  0x2c   :  { %p593_p8 = por %p592_p7, %p591_p6 }
  0x2e   :  { %p594_p9 = pnand %p593_p8, %p587_p5 }
  0x30   :  { %597 = shalt.err (!%p594_p9)
}
  0x31   :  { %49 = dma.hbm_to_vmem [thread:$0]  %s711_s3, 4096, %s44_s19, [#allocation5], %s604_s30, %s604_s30, %s605_s6  }
  0x32   :  { %598 = dma.done.wait [#allocation3], 256  }
  0x33   :  { %599 = vsyncadd [#allocation3], 4294967040 }
  0x34   :  { %600 = dma.done.wait [#allocation5], 4608  }
  0x35   :  { %601 = vsyncadd [#allocation5], 4294962688  ;;  %v607_v0 = vmov 0   ;;  %v470_v1 = vld [vmem:[#allocation4 + $0x4] ss:$8 sps:$4 sm:$0xff]   ;;  %v62_v5 = vld [vmem:[#allocation2] sm:$0xff]  ;;  %v71_v40 = vlaneseq }
  0x36   :  { %137 = vmatprep.mubr.bf16.mxu0 %v607_v0  ;;  %v472_v2 = vld [vmem:[#allocation4] ss:$8 sps:$4 sm:$0xff]   ;;  %105 = vmatprep.subr.bf16.mxu0 %v470_v1  ;;  %v473_v3 = vld [vmem:[#allocation4 + $0x14] ss:$8 sps:$4 sm:$0xff]   ;;  %v475_v4 = vld [vmem:[#allocation4 + $0x10] ss:$8 sps:$4 sm:$0xff]  }
  0x37   :  { %106 = vmatpush1.bf16.msra.mxu0 %v472_v2  ;;  %v63_v6 = vld [vmem:[#allocation2 + $0x8] sm:$0xff]  ;;  %v476_v7 = vld [vmem:[#allocation6 + $0x4] ss:$8 sps:$4 sm:$0xff]   ;;  %v478_v8 = vld [vmem:[#allocation6] ss:$8 sps:$4 sm:$0xff]   ;;  %vm101_vm0 = vcmask 261120  }
  0x38   :  { %107 = vmatprep.subr.bf16.mxu0 %v473_v3  ;;  %v479_v9 = vld [vmem:[#allocation6 + $0x14] ss:$8 sps:$4 sm:$0xff]   ;;  %v64_v10 = vpack.c.bf16 %v63_v6, %v62_v5  ;;  %374 = vmatprep.subr.bf16.mxu1 %v476_v7  ;;  %v481_v11 = vld [vmem:[#allocation6 + $0x10] ss:$8 sps:$4 sm:$0xff]   ;;  %v482_v12 = vld [vmem:[#allocation6 + $0x24] ss:$8 sps:$4 sm:$0xff]  }
  0x39   :  { %375 = vmatpush1.bf16.msra.mxu1 %v478_v8  ;;  %v484_v13 = vld [vmem:[#allocation6 + $0x20] ss:$8 sps:$4 sm:$0xff]   ;;  %v485_v14 = vld [vmem:[#allocation6 + $0x34] ss:$8 sps:$4 sm:$0xff]   ;;  %v487_v15 = vld [vmem:[#allocation6 + $0x30] ss:$8 sps:$4 sm:$0xff]  }
  0x3a   :  { %376 = vmatprep.subr.bf16.mxu1 %v479_v9  ;;  %v488_v16 = vld [vmem:[#allocation6 + $0x44] ss:$8 sps:$4 sm:$0xff]   ;;  %v490_v17 = vld [vmem:[#allocation6 + $0x40] ss:$8 sps:$4 sm:$0xff]   ;;  %v491_v18 = vld [vmem:[#allocation6 + $0x54] ss:$8 sps:$4 sm:$0xff]  }
  0x3b   :  { %108 = vmatpush1.bf16.msra.mxu0 %v475_v4  ;;  %v493_v19 = vld [vmem:[#allocation6 + $0x50] ss:$8 sps:$4 sm:$0xff]   ;;  %v494_v20 = vld [vmem:[#allocation6 + $0x64] ss:$8 sps:$4 sm:$0xff]   ;;  %v496_v21 = vld [vmem:[#allocation6 + $0x60] ss:$8 sps:$4 sm:$0xff]  }
  0x3c   :  { %v497_v22 = vld [vmem:[#allocation6 + $0x74] ss:$8 sps:$4 sm:$0xff]   ;;  %v499_v23 = vld [vmem:[#allocation6 + $0x70] ss:$8 sps:$4 sm:$0xff]   ;;  %v500_v24 = vld [vmem:[#allocation6 + $0x84] ss:$8 sps:$4 sm:$0xff]  }
  0x3d   :  { %377 = vmatpush1.bf16.msra.mxu1 %v481_v11  ;;  %v502_v25 = vld [vmem:[#allocation6 + $0x80] ss:$8 sps:$4 sm:$0xff]   ;;  %v503_v26 = vld [vmem:[#allocation6 + $0x94] ss:$8 sps:$4 sm:$0xff]   ;;  %v505_v27 = vld [vmem:[#allocation6 + $0x90] ss:$8 sps:$4 sm:$0xff]  }
  0x3e   :  { %431 = vmatmul.mubr.msk.bf16.vlgmr.msra.gmra.mrb[0].mxu0 %vm101_vm0, %v64_v10  ;;  %378 = vmatprep.subr.bf16.mxu1 %v482_v12  ;;  %v506_v28 = vld [vmem:[#allocation6 + $0xa4] ss:$8 sps:$4 sm:$0xff]   ;;  %v508_v29 = vld [vmem:[#allocation6 + $0xa0] ss:$8 sps:$4 sm:$0xff]   ;;  %v509_v30 = vld [vmem:[#allocation6 + $0xb4] ss:$8 sps:$4 sm:$0xff]  }
  0x3f   :  { %v511_v31 = vld [vmem:[#allocation6 + $0xb0] ss:$8 sps:$4 sm:$0xff]   ;;  %v512_v32 = vld [vmem:[#allocation6 + $0xc4] ss:$8 sps:$4 sm:$0xff]   ;;  %v514_v33 = vld [vmem:[#allocation6 + $0xc0] ss:$8 sps:$4 sm:$0xff]  }
  0x40   :  { %v515_v34 = vld [vmem:[#allocation6 + $0xd4] ss:$8 sps:$4 sm:$0xff]   ;;  %v517_v35 = vld [vmem:[#allocation6 + $0xd0] ss:$8 sps:$4 sm:$0xff]   ;;  %v518_v36 = vld [vmem:[#allocation6 + $0xe4] ss:$8 sps:$4 sm:$0xff]  }
  0x41   :  { %379 = vmatpush1.bf16.msra.mxu1 %v484_v13  ;;  %v520_v37 = vld [vmem:[#allocation6 + $0xe0] ss:$8 sps:$4 sm:$0xff]   ;;  %v521_v38 = vld [vmem:[#allocation6 + $0xf4] ss:$8 sps:$4 sm:$0xff]   ;;  %v523_v39 = vld [vmem:[#allocation6 + $0xf0] ss:$8 sps:$4 sm:$0xff]  }
  0x42   :  { %380 = vmatprep.subr.bf16.mxu1 %v485_v14  ;;  %v72_v41 = vshrl.u32 %v71_v40, 7  ;;  %v69_v43 = vld [vmem:[%s710_s2] sm:$0x3] }
  0x43   :  { %v202_v13 = vld [vmem:[%s712_s4] sm:$0x3] }
  0x44   :  { %v73_v42 = vsub.s32 0, %v72_v41  ;;  %v77_v44 = vsub.s32 1, %v72_v41 }
  0x45   :  { %381 = vmatpush1.bf16.msra.mxu1 %v487_v15 }
  0x46   :  { %382 = vmatprep.subr.bf16.mxu1 %v488_v16  ;;  %v74_v45 = vrot.slane %v69_v43, %v73_v42  ;;  %v78_v46 = vrot.slane %v69_v43, %v77_v44  ;;  %v207_v14 = vrot.slane %v202_v13, %v73_v42  ;;  %v211_v15 = vrot.slane %v202_v13, %v77_v44 }
  0x49   :  { %383 = vmatpush1.bf16.msra.mxu1 %v490_v17 }
  0x4a   :  { %384 = vmatprep.subr.bf16.mxu1 %v491_v18 }
  0x4d   :  { %385 = vmatpush1.bf16.msra.mxu1 %v493_v19 }
  0x4e   :  { %386 = vmatprep.subr.bf16.mxu1 %v494_v20 }
  0x51   :  { %387 = vmatpush1.bf16.msra.mxu1 %v496_v21 }
  0x52   :  { %388 = vmatprep.subr.bf16.mxu1 %v497_v22 }
  0x55   :  { %389 = vmatpush1.bf16.msra.mxu1 %v499_v23 }
  0x56   :  { %390 = vmatprep.subr.bf16.mxu1 %v500_v24 }
  0x59   :  { %391 = vmatpush1.bf16.msra.mxu1 %v502_v25 }
  0x5a   :  { %392 = vmatprep.subr.bf16.mxu1 %v503_v26 }
  0x5d   :  { %393 = vmatpush1.bf16.msra.mxu1 %v505_v27 }
  0x5e   :  { %394 = vmatprep.subr.bf16.mxu1 %v506_v28 }
  0x61   :  { %395 = vmatpush1.bf16.msra.mxu1 %v508_v29 }
  0x62   :  { %396 = vmatprep.subr.bf16.mxu1 %v509_v30 }
  0x65   :  { %397 = vmatpush1.bf16.msra.mxu1 %v511_v31 }
  0x66   :  { %398 = vmatprep.subr.bf16.mxu1 %v512_v32 }
  0x69   :  { %399 = vmatpush1.bf16.msra.mxu1 %v514_v33 }
  0x6a   :  { %400 = vmatprep.subr.bf16.mxu1 %v515_v34 }
  0x6d   :  { %401 = vmatpush1.bf16.msra.mxu1 %v517_v35 }
  0x6e   :  { %402 = vmatprep.subr.bf16.mxu1 %v518_v36 }
  0x71   :  { %403 = vmatpush1.bf16.msra.mxu1 %v520_v37 }
  0x72   :  { %404 = vmatprep.subr.bf16.mxu1 %v521_v38 }
  0x75   :  { %405 = vmatpush1.bf16.msra.mxu1 %v523_v39 }
 0x111   :  { %v139_v47 = vpop.f32.mrb[0].mxu0 }
 0x112   :  { %v140_v48 = vadd.f32 %v139_v47, %v74_v45  ;;  %v141_v49 = vpop.f32.mrb[1].mxu0 }
 0x113   :  { %v142_v50 = vadd.f32 %v141_v49, %v78_v46  ;;  %v143_v51 = vpop.f32.mrb[2].mxu0 }
 0x114   :  { %v152_v52 = vmul.f32 0.70710677, %v140_v48  ;;  %v144_v53 = vadd.f32 %v143_v51, %v74_v45  ;;  %v145_v54 = vpop.f32.mrb[3].mxu0  ;;  %v148_v1 = vmul.f32 0.5, %v140_v48 }
 0x115   :  { %v153_v55 = vmul.f32 0.70710677, %v142_v50  ;;  %v146_v56 = vadd.f32 %v145_v54, %v78_v46  ;;  %v149_v4 = vmul.f32 0.5, %v142_v50 }
 0x116   :  { %524 = verf.f32 %v152_v52  ;;  %v154_v57 = vmul.f32 0.70710677, %v144_v53  ;;  %v150_v2 = vmul.f32 0.5, %v144_v53 }
 0x117   :  { %526 = verf.f32 %v153_v55  ;;  %v155_v58 = vmul.f32 0.70710677, %v146_v56  ;;  %v151_v5 = vmul.f32 0.5, %v146_v56 }
 0x118   :  { %528 = verf.f32 %v154_v57 }
 0x119   :  { %530 = verf.f32 %v155_v58 }
 0x120   :  { %v525_v59 = vpop.eup %524 }
 0x121   :  { %v527_v60 = vpop.eup %526  ;;  %v160_v61 = vadd.f32 1.0, %v525_v59 }
 0x122   :  { %v529_v62 = vpop.eup %528  ;;  %v161_v63 = vadd.f32 1.0, %v527_v60 }
 0x123   :  { %v531_v0 = vpop.eup %530  ;;  %v162_v3 = vadd.f32 1.0, %v529_v62  ;;  %v164_v7 = vmul.f32 %v160_v61, %v148_v1 }
 0x124   :  { %v163_v6 = vadd.f32 1.0, %v531_v0  ;;  %v165_v9 = vmul.f32 %v161_v63, %v149_v4 }
 0x125   :  { %v166_v8 = vmul.f32 %v162_v3, %v150_v2 }
 0x126   :  { %v167_v10 = vmul.f32 %v163_v6, %v151_v5 }
 0x127   :  { %v168_v11 = vpack.c.bf16 %v166_v8, %v164_v7 }
 0x128   :  { %v169_v12 = vpack.c.bf16 %v167_v10, %v165_v9 }
 0x12a   :  { %406 = vmatprep.mubr.bf16.mxu1 %v169_v12 }
 0x12b   :  { %407 = vmatmul.mubr.bf16.vlgmr.msra.gmra.mrb[0].mxu1 %v168_v11 }
 0x1fe   :  { %v408_v16 = vpop.f32.mrb[0].mxu1 }
 0x1ff   :  { %v409_v17 = vadd.f32 %v408_v16, %v207_v14  ;;  %v410_v18 = vpop.f32.mrb[1].mxu1 }
 0x200   :  { %v411_v19 = vadd.f32 %v410_v18, %v211_v15  ;;  %v412_v20 = vpop.f32.mrb[2].mxu1 }
 0x201   :  { %417 = vst [vmem:[%s713_s5] sm:$0xff] %v409_v17  ;;  %v413_v21 = vadd.f32 %v412_v20, %v207_v14  ;;  %v414_v22 = vpop.f32.mrb[3].mxu1 }
 0x202   :  { %418 = vst [vmem:[%s713_s5 + $0x8] sm:$0xff] %v411_v19  ;;  %v415_v23 = vadd.f32 %v414_v22, %v211_v15 }
 0x203   :  { %419 = vst [vmem:[%s713_s5 + $0x10] sm:$0xff] %v413_v21 }
 0x204   :  { %420 = vst [vmem:[%s713_s5 + $0x18] sm:$0xff] %v415_v23 }
 0x205   :  { %425 = vsyncpa [#allocation3], 1 }
 0x206   :  { %426 = vsyncpa [#allocation5], 1 }

</bundles_post_ra>
